<compile_context>
chip_gen: v6e
topology: v6e:2x2x1
jax: 0.10.0
libtpu: 0.0.40
codegen_flags: <defaults>
</compile_context>

<pallas_src>
import jax
import jax.numpy as jnp
from jax import lax
from jax.experimental import pallas as pl
from jax.experimental.pallas import tpu as pltpu


_VMEM_SPEC = pl.BlockSpec(memory_space=pltpu.MemorySpace.VMEM)


# ---------------------------------------------------------------------------
# Kernel 1: per-sequence precompute  uh = linear_ctx(enc_hs)   (loop-invariant)
# ---------------------------------------------------------------------------
def _uh_kernel(enc_ref, wctx_ref, uh_ref):
    # enc_ref : (B, S, D)   wctx_ref : (D_out, D_in)  [PyTorch layout, no transpose]
    B, S, D = enc_ref.shape
    enc2d = enc_ref[...].reshape(B * S, D)            # collapse leading dims: ONE MXU matmul
    uh = lax.dot_general(enc2d, wctx_ref[...],
                         dimension_numbers=(((1,), (1,)), ((), ())),
                         preferred_element_type=jnp.float32)
    uh_ref[...] = uh.reshape(B, S, uh_ref.shape[-1])


def precompute_uh(enc_hs, w_ctx):
    """uh = enc_hs @ W_ctx^T, computed once per sequence (hoisted out of decode steps)."""
    B, S, _ = enc_hs.shape
    D_out = w_ctx.shape[0]
    return pl.pallas_call(
        _uh_kernel,
        out_shape=jax.ShapeDtypeStruct((B, S, D_out), jnp.float32),
        in_specs=[_VMEM_SPEC, _VMEM_SPEC],
        out_specs=_VMEM_SPEC,
    )(enc_hs, w_ctx)


# ---------------------------------------------------------------------------
# Kernel 2: fused per-decoder-step attention
#   (linear_query + tanh + v-proj + masked softmax + weighted sum)
# ---------------------------------------------------------------------------
def _attention_step_kernel(enc_ref, uh_ref, sprev_ref, bias_ref,
                           wq_ref, bq_ref, vw_ref, ctx_ref, attn_ref):
    # enc_ref  : (B, S, D)   encoder hidden states
    # uh_ref   : (B, S, D)   precomputed linear_ctx(enc_hs)
    # sprev_ref: (B, D)      previous decoder state (squeezed from (B, 1, D))
    # bias_ref : (B, S)      additive mask bias: 0.0 keep / -1e30 masked
    # wq_ref   : (D, D)      linear_query.weight (out, in) — contracted on axis 1
    # bq_ref   : (1, D)      linear_query.bias
    # vw_ref   : (1, D)      v.weight (row vector); v.bias omitted (cancels in softmax)
    # ctx_ref  : (B, D)      output context vector
    # attn_ref : (B, S)      output attention weights
    enc = enc_ref[...]                                            # (B, S, D)

    # linear_query: (B, D) contracted with (D_out, D_in) on in-features; no transpose.
    wq = lax.dot_general(sprev_ref[...], wq_ref[...],
                         dimension_numbers=(((1,), (1,)), ((), ())),
                         preferred_element_type=jnp.float32) + bq_ref[...]   # (B, D)

    # Fused tanh + v-projection: wquh never materialized as a separate live tensor.
    # (VPU add + EUP tanh + VPU mul + XLU lane reduce.)
    scores = jnp.sum(jnp.tanh(uh_ref[...] + wq[:, None, :]) * vw_ref[...],
                     axis=-1)                                     # (B, S)

    # Masked softmax via additive bias (single VPU add; finite fill avoids NaN rows).
    scores = scores + bias_ref[...]
    m = jnp.max(scores, axis=-1, keepdims=True)
    e = jnp.exp(scores - m)
    attn = e / jnp.sum(e, axis=-1, keepdims=True)                 # (B, S)
    attn_ref[...] = attn

    # ctx[b, :] = sum_s attn[b, s] * enc[b, s, :]
    # TODO(synk): at real dims (large S*D) switch this to a batched dot_general on the MXU.
    ctx_ref[...] = jnp.sum(attn[:, :, None] * enc, axis=1)        # (B, D)


def attention_step(s_prev, enc_hs, uh, mask_bias, w_q, b_q, v_w):
    """One decoder-step attention, reusing precomputed uh and mask_bias."""
    B, S, D = enc_hs.shape
    ctx, attn = pl.pallas_call(
        _attention_step_kernel,
        out_shape=(jax.ShapeDtypeStruct((B, D), jnp.float32),
                   jax.ShapeDtypeStruct((B, S), jnp.float32)),
        in_specs=[_VMEM_SPEC] * 7,
        out_specs=(_VMEM_SPEC, _VMEM_SPEC),
    )(enc_hs, uh, s_prev.reshape(B, D), mask_bias,
      w_q, b_q.reshape(1, D), v_w)
    return ctx, attn


def attention(s_prev, enc_hs, src_mask, w_ctx, w_q, b_q, v_w, v_b):
    """Full Attention.forward equivalent (single call).

    s_prev: (B, 1, D); enc_hs: (B, S, D); src_mask: (B, S) bool (True = masked).
    Weights in PyTorch nn.Linear layout (out_features, in_features).
    Returns (ctx (B, D), attn_weights (B, S)).
    """
    del v_b  # constant added to every score; cancels in softmax (post-softmax identical)
    # Per-sequence (loop-invariant) precompute: in a decode loop, call these once
    # and then call `attention_step` per step.
    uh = precompute_uh(enc_hs, w_ctx)
    mask_bias = jnp.where(src_mask, jnp.float32(-1e30), jnp.float32(0.0))
    return attention_step(s_prev, enc_hs, uh, mask_bias, w_q, b_q, v_w)


# ---------------------------------------------------------------------------
# Pure-JAX reference (mirrors the PyTorch forward exactly)
# ---------------------------------------------------------------------------
def attention_reference(s_prev, enc_hs, src_mask, w_ctx, w_q, b_q, v_w, v_b):
    hi = lax.Precision.HIGHEST
    uh = jnp.einsum("bsd,ed->bse", enc_hs, w_ctx, precision=hi)            # linear_ctx
    wq = jnp.einsum("bod,ed->boe", s_prev, w_q, precision=hi) + b_q        # linear_query
    wquh = jnp.tanh(wq + uh)
    scores = jnp.einsum("bsd,od->bso", wquh, v_w, precision=hi)[..., 0] + v_b[0]
    scores = jnp.where(src_mask, -jnp.inf, scores)
    attn = jax.nn.softmax(scores, axis=-1)
    ctx = jnp.einsum("bs,bsd->bd", attn, enc_hs, precision=hi)
    return ctx, attn


# ---------------------------------------------------------------------------
# main
# ---------------------------------------------------------------------------
if __name__ == "__main__":
    B, S, D = 2, 8, 64        # batch, source length, input_dim (e.g. 2*dec_hidden)

    key = jax.random.PRNGKey(0)
    k = jax.random.split(key, 7)
    scale = 0.1
    # weights in the PyTorch nn.Linear layout (out_features, in_features)
    w_ctx = scale * jax.random.normal(k[0], (D, D), jnp.float32)   # linear_ctx.weight
    w_q   = scale * jax.random.normal(k[1], (D, D), jnp.float32)   # linear_query.weight
    b_q   = scale * jax.random.normal(k[2], (D,), jnp.float32)     # linear_query.bias
    v_w   = scale * jax.random.normal(k[3], (1, D), jnp.float32)   # v.weight
    v_b   = scale * jax.random.normal(k[4], (1,), jnp.float32)     # v.bias

    enc_hs = jax.random.normal(k[5], (B, S, D), jnp.float32)
    s_prev = jax.random.normal(k[6], (B, 1, D), jnp.float32)
    lengths = jnp.array([S, 5], dtype=jnp.int32)
    src_mask = jnp.arange(S)[None, :] >= lengths[:, None]          # True = padded position

    # Single-call path (semantics of Attention.forward)
    fwd = jax.jit(attention)
    ctx, attn = fwd(s_prev, enc_hs, src_mask, w_ctx, w_q, b_q, v_w, v_b)
    ctx, attn = jax.block_until_ready((ctx, attn))

    # Decode-loop path: hoisted per-sequence precompute + per-step kernel reuse.
    uh = jax.block_until_ready(precompute_uh(enc_hs, w_ctx))
    mask_bias = jnp.where(src_mask, jnp.float32(-1e30), jnp.float32(0.0))
    step = jax.jit(attention_step)
    ctx2, attn2 = jax.block_until_ready(step(s_prev, enc_hs, uh, mask_bias, w_q, b_q, v_w))

    # correctness vs the pure-JAX reference
    ctx_exp, attn_exp = attention_reference(s_prev, enc_hs, src_mask,
                                            w_ctx, w_q, b_q, v_w, v_b)
    assert ctx.shape == (B, D) and attn.shape == (B, S), (ctx.shape, attn.shape)
    assert bool(jnp.all(jnp.isfinite(ctx))) and bool(jnp.all(jnp.isfinite(attn)))
    assert bool(jnp.allclose(jnp.sum(attn, axis=-1), 1.0, atol=1e-5))
    assert bool(jnp.all(jnp.where(src_mask, attn, 0.0) == 0.0))    # masked lanes -> exactly 0
    assert bool(jnp.allclose(attn, attn_exp, atol=1e-3, rtol=1e-3))
    assert bool(jnp.allclose(ctx, ctx_exp, atol=1e-3, rtol=1e-3))
    # hoisted path matches the single-call path
    assert bool(jnp.allclose(attn2, attn, atol=1e-6))
    assert bool(jnp.allclose(ctx2, ctx, atol=1e-6))

    print("KERNEL_OK")
</pallas_src>

<mosaic_0001>
module attributes {stable_mosaic.version = 11 : i64} {
  func.func @_uh_kernel(%arg0: memref<2x8x64xf32, #tpu.memory_space<vmem>>, %arg1: memref<64x64xf32, #tpu.memory_space<vmem>>, %arg2: memref<2x8x64xf32, #tpu.memory_space<vmem>>) attributes {dimension_semantics = [], scalar_prefetch = 0 : i64, scratch_operands = 0 : i64, tpu.core_type = #tpu.core_type<tc>} {
    %c0 = arith.constant 0 : index
    %c0_0 = arith.constant 0 : index
    %c0_1 = arith.constant 0 : index
    %0 = vector.load %arg0[%c0, %c0_0, %c0_1] : memref<2x8x64xf32, #tpu.memory_space<vmem>>, vector<2x8x64xf32>
    %1 = vector.shape_cast %0 : vector<2x8x64xf32> to vector<16x64xf32>
    %c0_2 = arith.constant 0 : index
    %c0_3 = arith.constant 0 : index
    %2 = vector.load %arg1[%c0_2, %c0_3] : memref<64x64xf32, #tpu.memory_space<vmem>>, vector<64x64xf32>
    %cst = arith.constant dense<0.000000e+00> : vector<16x64xf32>
    %3 = tpu.matmul %1, %2, %cst {dimension_numbers = #tpu.dot_dimension_numbers<[1], [1], [0], [0], [0, 0, 1, 0], [], []>} : vector<16x64xf32>, vector<64x64xf32>, vector<16x64xf32> -> vector<16x64xf32>
    %4 = vector.shape_cast %3 : vector<16x64xf32> to vector<2x8x64xf32>
    %c0_4 = arith.constant 0 : index
    %c0_5 = arith.constant 0 : index
    %c0_6 = arith.constant 0 : index
    %5 = vector.load %arg2[%c0_4, %c0_5, %c0_6] : memref<2x8x64xf32, #tpu.memory_space<vmem>>, vector<2x8x64xf32>
    tpu.vector_store %arg2[%c0_4, %c0_5, %c0_6], %4 {strides = array<i32>} : memref<2x8x64xf32, #tpu.memory_space<vmem>>, vector<2x8x64xf32>,
    return
  }
}

module attributes {stable_mosaic.version = 11 : i64} {
  func.func @_attention_step_kernel(%arg0: memref<2x8x64xf32, #tpu.memory_space<vmem>>, %arg1: memref<2x8x64xf32, #tpu.memory_space<vmem>>, %arg2: memref<2x64xf32, #tpu.memory_space<vmem>>, %arg3: memref<2x8xf32, #tpu.memory_space<vmem>>, %arg4: memref<64x64xf32, #tpu.memory_space<vmem>>, %arg5: memref<1x64xf32, #tpu.memory_space<vmem>>, %arg6: memref<1x64xf32, #tpu.memory_space<vmem>>, %arg7: memref<2x64xf32, #tpu.memory_space<vmem>>, %arg8: memref<2x8xf32, #tpu.memory_space<vmem>>) attributes {dimension_semantics = [], scalar_prefetch = 0 : i64, scratch_operands = 0 : i64, tpu.core_type = #tpu.core_type<tc>} {
    %c0 = arith.constant 0 : index
    %c0_0 = arith.constant 0 : index
    %c0_1 = arith.constant 0 : index
    %0 = vector.load %arg0[%c0, %c0_0, %c0_1] : memref<2x8x64xf32, #tpu.memory_space<vmem>>, vector<2x8x64xf32>
    %c0_2 = arith.constant 0 : index
    %c0_3 = arith.constant 0 : index
    %1 = vector.load %arg2[%c0_2, %c0_3] : memref<2x64xf32, #tpu.memory_space<vmem>>, vector<2x64xf32>
    %c0_4 = arith.constant 0 : index
    %c0_5 = arith.constant 0 : index
    %2 = vector.load %arg4[%c0_4, %c0_5] : memref<64x64xf32, #tpu.memory_space<vmem>>, vector<64x64xf32>
    %cst = arith.constant dense<0.000000e+00> : vector<2x64xf32>
    %3 = tpu.matmul %1, %2, %cst {dimension_numbers = #tpu.dot_dimension_numbers<[1], [1], [0], [0], [0, 0, 1, 0], [], []>} : vector<2x64xf32>, vector<64x64xf32>, vector<2x64xf32> -> vector<2x64xf32>
    %c0_6 = arith.constant 0 : index
    %c0_7 = arith.constant 0 : index
    %4 = vector.load %arg5[%c0_6, %c0_7] : memref<1x64xf32, #tpu.memory_space<vmem>>, vector<1x64xf32>
    %5 = vector.broadcast %4 : vector<1x64xf32> to vector<2x64xf32>
    %6 = arith.addf %3, %5 : vector<2x64xf32>
    %c0_8 = arith.constant 0 : index
    %c0_9 = arith.constant 0 : index
    %c0_10 = arith.constant 0 : index
    %7 = vector.load %arg1[%c0_8, %c0_9, %c0_10] : memref<2x8x64xf32, #tpu.memory_space<vmem>>, vector<2x8x64xf32>
    %8 = vector.shape_cast %6 : vector<2x64xf32> to vector<2x1x64xf32>
    %9 = vector.broadcast %8 : vector<2x1x64xf32> to vector<2x8x64xf32>
    %10 = arith.addf %7, %9 : vector<2x8x64xf32>
    %11 = math.tanh %10 : vector<2x8x64xf32>
    %c0_11 = arith.constant 0 : index
    %c0_12 = arith.constant 0 : index
    %12 = vector.load %arg6[%c0_11, %c0_12] : memref<1x64xf32, #tpu.memory_space<vmem>>, vector<1x64xf32>
    %13 = vector.shape_cast %12 : vector<1x64xf32> to vector<1x1x64xf32>
    %14 = vector.broadcast %13 : vector<1x1x64xf32> to vector<2x8x64xf32>
    %15 = arith.mulf %11, %14 : vector<2x8x64xf32>
    %cst_13 = arith.constant dense<0.000000e+00> : vector<2x8xf32>
    %16 = vector.multi_reduction <add>, %15, %cst_13 [2] : vector<2x8x64xf32> to vector<2x8xf32>
    %c0_14 = arith.constant 0 : index
    %c0_15 = arith.constant 0 : index
    %17 = vector.load %arg3[%c0_14, %c0_15] : memref<2x8xf32, #tpu.memory_space<vmem>>, vector<2x8xf32>
    %18 = arith.addf %16, %17 : vector<2x8xf32>
    %cst_16 = arith.constant dense<0xFF800000> : vector<2xf32>
    %19 = vector.multi_reduction <maximumf>, %18, %cst_16 [1] : vector<2x8xf32> to vector<2xf32>
    %20 = vector.shape_cast %19 : vector<2xf32> to vector<2x1xf32>
    %21 = vector.broadcast %20 : vector<2x1xf32> to vector<2x8xf32>
    %22 = arith.subf %18, %21 : vector<2x8xf32>
    %23 = math.exp %22 : vector<2x8xf32>
    %cst_17 = arith.constant dense<0.000000e+00> : vector<2xf32>
    %24 = vector.multi_reduction <add>, %23, %cst_17 [1] : vector<2x8xf32> to vector<2xf32>
    %25 = vector.shape_cast %24 : vector<2xf32> to vector<2x1xf32>
    %26 = vector.broadcast %25 : vector<2x1xf32> to vector<2x8xf32>
    %27 = arith.divf %23, %26 : vector<2x8xf32>
    %c0_18 = arith.constant 0 : index
    %c0_19 = arith.constant 0 : index
    %28 = vector.load %arg8[%c0_18, %c0_19] : memref<2x8xf32, #tpu.memory_space<vmem>>, vector<2x8xf32>
    tpu.vector_store %arg8[%c0_18, %c0_19], %27 {strides = array<i32>} : memref<2x8xf32, #tpu.memory_space<vmem>>, vector<2x8xf32>,
    %29 = vector.shape_cast %27 : vector<2x8xf32> to vector<2x8x1xf32>
    %30 = vector.broadcast %29 : vector<2x8x1xf32> to vector<2x8x64xf32>
    %31 = arith.mulf %30, %0 : vector<2x8x64xf32>
    %cst_20 = arith.constant dense<0.000000e+00> : vector<2x64xf32>
    %32 = vector.multi_reduction <add>, %31, %cst_20 [1] : vector<2x8x64xf32> to vector<2x64xf32>
    %c0_21 = arith.constant 0 : index
    %c0_22 = arith.constant 0 : index
    %33 = vector.load %arg7[%c0_21, %c0_22] : memref<2x64xf32, #tpu.memory_space<vmem>>, vector<2x64xf32>
    tpu.vector_store %arg7[%c0_21, %c0_22], %32 {strides = array<i32>} : memref<2x64xf32, #tpu.memory_space<vmem>>, vector<2x64xf32>,
    return
  }
}

</mosaic_0001>

<bundles_post_ra>
// kernel: attention.2
= control target key start
LH: loop header
LB: loop body
LE: loop exit
PB: predicated region body
PF: predicated region fallthrough
CT: control target
= control target key end

     0   :  { %7 = vsyncpa [#allocation3], 0  ;;  %s212_s9 = smov [#allocation2]   ;;  %s265_s0 = inlined_call_operand.vmem [shape: f32[2,8,64], index: 0, kind: input, shape index: {}]   ;;  %s266_s1 = inlined_call_operand.hbm [shape: f32[64,64], index: 1, kind: input, shape index: {}]   ;;  %s267_s2 = inlined_call_operand.vmem [shape: f32[2,8,64], index: 2, kind: output, shape index: {}]  }
   0x1   :  { %s15_s10 = sshll.u32 %s212_s9, 4  ;;  %s16_s10 = int_to_ptr.vmem [resolvable:$true] %s15_s10 }
   0x2   :  { %s198_s11 = scalar_lea.vmem %s16_s10, 1024  ;;  %p203_p1 = scmp.lt.s32.totalorder %s16_s10, %s16_s10 }
   0x3   :  { %p199_p0 = scmp.ne.s32.totalorder %s16_s10, %s198_s11  ;;  %p204_p2 = scmp.lt.s32.totalorder %s198_s11, %s198_s11 }
   0x5   :  { %p205_p3 = por %p204_p2, %p203_p1 }
   0x7   :  { %p206_p4 = pnand %p205_p3, %p199_p0 }
   0x9   :  { %209 = shalt.err (!%p206_p4)
}
   0xa   :  { %s213_s12 = smov 128   ;;  %s214_s13 = smov 8  }
   0xb   :  { %21 = dma.hbm_to_vmem [thread:$0]  %s266_s1, 1024, %s16_s10, [#allocation3], %s213_s12, %s213_s12, %s214_s13  }
   0xc   :  { %210 = dma.done.wait [#allocation3], 1024  }
   0xd   :  { %211 = vsyncadd [#allocation3], 4294966272  ;;  %vm35_vm0 = vcmask 523264   ;;  %v34_v0 = vld [vmem:[#allocation2 + $0x38] sm:$0xff]  ;;  %v33_v1 = vld [vmem:[#allocation2 + $0x30] sm:$0xff] }
   0xe   :  { %168 = vmatprep.subr.msk.mxu0 %vm35_vm0, %v34_v0  ;;  %v25_v2 = vld [vmem:[%s265_s0] sm:$0xff]  ;;  %v32_v3 = vld [vmem:[#allocation2 + $0x28] sm:$0xff]  ;;  %v30_v5 = vld [vmem:[#allocation2 + $0x18] sm:$0xff] }
   0xf   :  { %169 = vmatpush3.xpose.msk.msra.mxu0 %vm35_vm0, %v34_v0  ;;  %184 = vmatprep.mubr.msk.f32.mxu0 %vm35_vm0, %v25_v2  ;;  %v31_v4 = vld [vmem:[#allocation2 + $0x20] sm:$0xff]  ;;  %v29_v6 = vld [vmem:[#allocation2 + $0x10] sm:$0xff]  ;;  %v28_v7 = vld [vmem:[#allocation2 + $0x8] sm:$0xff] }
  0x10   :  { %170 = vmatprep.subr.msk.mxu0 %vm35_vm0, %v33_v1  ;;  %v27_v8 = vld [vmem:[#allocation2] sm:$0xff]  ;;  %v26_v9 = vld [vmem:[%s265_s0 + $0x8] sm:$0xff] }
  0x13   :  { %171 = vmatpush3.xpose.msk.msra.mxu0 %vm35_vm0, %v33_v1 }
  0x14   :  { %172 = vmatprep.subr.msk.mxu0 %vm35_vm0, %v32_v3 }
  0x17   :  { %173 = vmatpush3.xpose.msk.msra.mxu0 %vm35_vm0, %v32_v3 }
  0x18   :  { %174 = vmatprep.subr.msk.mxu0 %vm35_vm0, %v31_v4 }
  0x1b   :  { %175 = vmatpush3.xpose.msk.msra.mxu0 %vm35_vm0, %v31_v4 }
  0x1c   :  { %176 = vmatprep.subr.msk.mxu0 %vm35_vm0, %v30_v5 }
  0x1f   :  { %177 = vmatpush3.xpose.msk.msra.mxu0 %vm35_vm0, %v30_v5 }
  0x20   :  { %178 = vmatprep.subr.msk.mxu0 %vm35_vm0, %v29_v6 }
  0x23   :  { %179 = vmatpush3.xpose.msk.msra.mxu0 %vm35_vm0, %v29_v6 }
  0x24   :  { %180 = vmatprep.subr.msk.mxu0 %vm35_vm0, %v28_v7 }
  0x27   :  { %181 = vmatpush3.xpose.msk.msra.mxu0 %vm35_vm0, %v28_v7 }
  0x28   :  { %182 = vmatprep.subr.msk.mxu0 %vm35_vm0, %v27_v8 }
  0x2b   :  { %183 = vmatpush3.xpose.msk.msra.mxu0 %vm35_vm0, %v27_v8 }
  0x2e   :  { %185 = vmatmul.mubr.msk.f32.vlgmr.msra.gmra.mxu0 %vm35_vm0, %v26_v9 }
  0xee   :  { %v186_v10 = vpop.f32.mrf.mxu0 }
  0xef   :  { %142 = vst.msk [vmem:[%s267_s2 + $0x8] sm:$0xff] %vm35_vm0, %v186_v10 }
  0xf0   :  { %v132_v11 = vpop.f32.mrf.mxu0 }
  0xf1   :  { %141 = vst.msk [vmem:[%s267_s2] sm:$0xff] %vm35_vm0, %v132_v11 }
  0xf2   :  { %147 = vsyncpa [#allocation3], 1 }

// kernel: attention.3
= control target key start
LH: loop header
LB: loop body
LE: loop exit
PB: predicated region body
PF: predicated region fallthrough
CT: control target
= control target key end

     0   :  { %14 = vsyncpa [#allocation3], 0  ;;  %vm48_vm0 = vcmask 523264   ;;  %v472_v1 = vmov 0.0   ;;  %vm473_vm1 = vmmov 0   ;;  %s609_s0 = inlined_call_operand.vmem [shape: f32[2,8,64], index: 0, kind: input, shape index: {}]   ;;  %s610_s1 = inlined_call_operand.vmem [shape: f32[2,8,64], index: 1, kind: input, shape index: {}]   ;;  %s611_s2 = inlined_call_operand.vmem [shape: f32[2,64], index: 2, kind: input, shape index: {}]   ;;  %s612_s3 = inlined_call_operand.vmem [shape: f32[2,8], index: 3, kind: input, shape index: {}]   ;;  %s613_s4 = inlined_call_operand.vmem [shape: f32[64,64], index: 4, kind: input, shape index: {}]   ;;  %s614_s5 = inlined_call_operand.vmem [shape: f32[1,64], index: 5, kind: input, shape index: {}]   ;;  %s615_s6 = inlined_call_operand.vmem [shape: f32[1,64], index: 6, kind: input, shape index: {}]   ;;  %s616_s7 = inlined_call_operand.hbm [shape: f32[2,64], index: 7, kind: output, shape index: {0}]   ;;  %s617_s8 = inlined_call_operand.hbm [shape: f32[2,8], index: 8, kind: output, shape index: {1}]  }
   0x1   :  { %v40_v0 = vld [vmem:[%s613_s4 + $0x38] sm:$0xff]  ;;  %389 = vmatprep.subr.mxu0 %v472_v1  ;;  %405 = vmatprep.mubr.msk.f32.mxu0 %vm473_vm1, %v472_v1  ;;  %v39_v2 = vld [vmem:[%s613_s4 + $0x30] sm:$0xff] }
   0x2   :  { %390 = vmatpush3.xpose.msk.msra.mxu0 %vm48_vm0, %v40_v0 }
   0x3   :  { %391 = vmatprep.subr.mxu0 %v472_v1 }
   0x4   :  { %15 = vsyncpa [#allocation5], 0  ;;  %v38_v3 = vld [vmem:[%s613_s4 + $0x28] sm:$0xff]  ;;  %v37_v4 = vld [vmem:[%s613_s4 + $0x20] sm:$0xff]  ;;  %v152_v10 = vlaneseq  ;;  %v474_v17 = vmov 1966171168  }
   0x5   :  { %v36_v5 = vld [vmem:[%s613_s4 + $0x18] sm:$0xff]  ;;  %v35_v6 = vld [vmem:[%s613_s4 + $0x10] sm:$0xff]  ;;  %v34_v7 = vld [vmem:[%s613_s4 + $0x8] sm:$0xff]  ;;  %v150_v18 = vunpack.c.l.s4 %v474_v17  ;;  %v475_v42 = vmov 0   ;;  %vm238_vm2 = vcmask 1041409   ;;  %vm241_vm3 = vcmask 58368  }
   0x6   :  { %392 = vmatpush3.xpose.msk.msra.mxu0 %vm48_vm0, %v39_v2  ;;  %v33_v8 = vld [vmem:[%s613_s4] sm:$0xff]  ;;  %v153_v11 = vshrl.u32 %v152_v10, 7  ;;  %v147_v31 = vld [vmem:[%s610_s1 + $0x8] sm:$0xff]  ;;  %414 = vset.pattern.permute.xlu0 %v475_v42  ;;  %v229_v49 = vand.u32 127, %v152_v10  ;;  %s476_s9 = smov [#allocation4]  }
   0x7   :  { %393 = vmatprep.subr.mxu0 %v472_v1  ;;  %v32_v9 = vld [vmem:[%s611_s2] sm:$0x3]  ;;  %v151_v19 = vunpack.c.0.s8 %v150_v18  ;;  %415 = vset.pattern.permute.xlu1 %v475_v42  ;;  %s357_s10 = sshll.u32 %s476_s9, 4  ;;  %s358_s10 = int_to_ptr.vmem [resolvable:$true] %s357_s10 }
   0x8   :  { %v559_v12 = vsub.s32 0, %v153_v11  ;;  %v200_v13 = vld [vmem:[%s612_s3] sm:$0x3]  ;;  %v564_v14 = vsub.s32 1, %v153_v11  ;;  %v232_v50 = vsub.s32 %v229_v49, %v153_v11  ;;  %p433_p1 = scmp.lt.s32.totalorder %s358_s10, %s358_s10 }
   0x9   :  { %v369_v20 = vld [vmem:[%s614_s5] ss:$0 sm:$0xff]  ;;  %v154_v21 = vsub.s32 %v151_v19, %v153_v11 }
   0xa   :  { %394 = vmatpush3.xpose.msk.msra.mxu0 %vm48_vm0, %v38_v3  ;;  %v205_v15 = vrot.slane %v200_v13, %v559_v12  ;;  %v212_v16 = vrot.slane %v200_v13, %v564_v14  ;;  %v146_v28 = vld [vmem:[%s610_s1] sm:$0xff] }
   0xb   :  { %395 = vmatprep.subr.mxu0 %v472_v1  ;;  %v379_v35 = vld [vmem:[%s615_s6] ss:$0 sm:$0xff] }
   0xc   :  { %207 = vbcast.lane.b32.xlu1 %v205_v15, 256  ;;  %v30_v17 = vld [vmem:[%s609_s0] sm:$0xff] }
   0xe   :  { %396 = vmatpush3.xpose.msk.msra.mxu0 %vm48_vm0, %v37_v4 }
   0xf   :  { %397 = vmatprep.subr.mxu0 %v472_v1 }
  0x10   :  { %214 = vbcast.lane.b32.xlu1 %v212_v16, 256 }
  0x12   :  { %398 = vmatpush3.xpose.msk.msra.mxu0 %vm48_vm0, %v36_v5 }
  0x13   :  { %399 = vmatprep.subr.mxu0 %v472_v1 }
  0x16   :  { %400 = vmatpush3.xpose.msk.msra.mxu0 %vm48_vm0, %v35_v6 }
  0x17   :  { %401 = vmatprep.subr.mxu0 %v472_v1 }
  0x1a   :  { %402 = vmatpush3.xpose.msk.msra.mxu0 %vm48_vm0, %v34_v7 }
  0x1b   :  { %403 = vmatprep.subr.mxu0 %v472_v1 }
  0x1e   :  { %404 = vmatpush3.xpose.msk.msra.mxu0 %vm48_vm0, %v33_v8 }
  0x21   :  { %406 = vmatmul.mubr.msk.f32.vlgmr.msra.gmra.mxu0 %vm48_vm0, %v32_v9 }
  0x7e   :  { %v208_v43 = vpop.permute.xlu1 %207 }
  0x82   :  { %v215_v46 = vpop.permute.xlu1 %214 }
  0xe1   :  { %v142_v22 = vpop.f32.mrf.mxu0 }
  0xe2   :  { %v143_v23 = vadd.f32 %v369_v20, %v142_v22 }
  0xe3   :  { %v407_v24 = vpop.f32.mrf.mxu0 }
  0xe4   :  { %v155_v25 = vrot.slane %v143_v23, %v154_v21 }
  0xe6   :  { %v156_v26 = vcombine.high %v155_v25, %v155_v25  ;;  %v163_v27 = vrot.slane %v155_v25, %v154_v21 }
  0xe8   :  { %v170_v29 = vrot.slane %v156_v26, %v154_v21  ;;  %v174_v30 = vrot.slane %v163_v27, %v559_v12 }
  0xea   :  { %v178_v32 = vrot.slane %v170_v29, %v559_v12  ;;  %v181_v33 = vadd.f32 %v174_v30, %v146_v28 }
  0xec   :  { %v182_v34 = vadd.f32 %v178_v32, %v147_v31  ;;  %416 = vtanh.f32 %v181_v33 }
  0xee   :  { %418 = vtanh.f32 %v182_v34 }
  0xf9   :  { %v417_v36 = vpop.eup %416 }
  0xfa   :  { %v192_v37 = vmul.f32 %v417_v36, %v379_v35 }
  0xfb   :  { %v419_v38 = vpop.eup %418 }
  0xfc   :  { %v194_v39 = vsel %vm48_vm0, %v192_v37, 0.0  ;;  %v193_v40 = vmul.f32 %v419_v38, %v379_v35 }
  0xfd   :  { %195 = vadd.xlane.f32.xlu0 %v194_v39 }
  0xfe   :  { %v197_v41 = vsel %vm48_vm0, %v193_v40, 0.0 }
 0x101   :  { %198 = vadd.xlane.f32.xlu0 %v197_v41 }
 0x186   :  { %v196_v44 = vpop.xlane.xlu0 %195 }
 0x187   :  { %v218_v45 = vadd.f32 %v208_v43, %v196_v44 }
 0x189   :  { %223 = vperm.xlu0 %414, %v218_v45  }
 0x18a   :  { %v199_v47 = vpop.xlane.xlu0 %198 }
 0x18b   :  { %v219_v48 = vadd.f32 %v215_v46, %v199_v47 }
 0x18d   :  { %226 = vperm.xlu1 %415, %v219_v48  }
 0x204   :  { %v224_v51 = vpop.permute.xlu0 %223 }
 0x205   :  { %v233_v53 = vrot.slane %v224_v51, %v232_v50 }
 0x208   :  { %v227_v52 = vpop.permute.xlu1 %226 }
 0x209   :  { %v237_v54 = vrot.slane %v227_v52, %v232_v50 }
 0x20b   :  { %v239_v55 = vsel %vm238_vm2, %v237_v54, %v233_v53 }
 0x20c   :  { %v242_v56 = vsel %vm241_vm3, %v239_v55, -inf }
 0x20d   :  { %243 = vmax.xlane.f32.xlu1 %v242_v56 }
 0x296   :  { %v244_v57 = vpop.xlane.xlu1 %243 }
 0x297   :  { %v249_v58 = vrot.slane %v244_v57, %v559_v12  ;;  %v253_v59 = vrot.slane %v244_v57, %v564_v14 }
 0x299   :  { %v256_v60 = vsub.f32 %v218_v45, %v249_v58  ;;  %v257_v61 = vsub.f32 %v219_v48, %v253_v59 }
 0x29b   :  { %v258_v62 = vmul.f32 1.442695, %v256_v60  ;;  %v260_v63 = vmul.f32 1.442695, %v257_v61 }
 0x29d   :  { %420 = vpow2.f32 %v258_v62 }
 0x29e   :  { %422 = vpow2.f32 %v260_v63 }
 0x2aa   :  { %v421_v0 = vpop.eup %420 }
 0x2ab   :  { %v423_v1 = vpop.eup %422  ;;  %265 = vperm.xlu1 %415, %v421_v0  }
 0x2ac   :  { %268 = vperm.xlu0 %414, %v423_v1  }
 0x326   :  { %v266_v2 = vpop.permute.xlu1 %265 }
 0x327   :  { %v269_v3 = vpop.permute.xlu0 %268  ;;  %v273_v4 = vrot.slane %v266_v2, %v232_v50 }
 0x328   :  { %v277_v5 = vrot.slane %v269_v3, %v232_v50 }
 0x32a   :  { %v278_v6 = vsel %vm238_vm2, %v277_v5, %v273_v4 }
 0x32b   :  { %v280_v7 = vsel %vm241_vm3, %v278_v6, 0.0 }
 0x32c   :  { %281 = vadd.xlane.f32.xlu0 %v280_v7 }
 0x3b5   :  { %v282_v8 = vpop.xlane.xlu0 %281 }
 0x3b6   :  { %v287_v9 = vrot.slane %v282_v8, %v559_v12  ;;  %v291_v10 = vrot.slane %v282_v8, %v564_v14  ;;  %v31_v12 = vld [vmem:[%s609_s0 + $0x8] sm:$0xff]  ;;  %s428_s0 = scalar_lea.vmem %s358_s10, 32 }
 0x3b7   :  { %p429_p0 = scmp.ne.s32.totalorder %s358_s10, %s428_s0  ;;  %p434_p2 = scmp.lt.s32.totalorder %s428_s0, %s428_s0 }
 0x3b8   :  { %424 = vrcp.f32 %v287_v9 }
 0x3b9   :  { %426 = vrcp.f32 %v291_v10  ;;  %p435_p3 = por %p434_p2, %p433_p1 }
 0x3bb   :  { %p436_p4 = pnand %p435_p3, %p429_p0 }
 0x3c5   :  { %v425_v11 = vpop.eup %424 }
 0x3c6   :  { %v295_v13 = vmul.f32 %v425_v11, %v421_v0  ;;  %v427_v15 = vpop.eup %426 }
 0x3c7   :  { %v297_v16 = vmul.f32 %v427_v15, %v423_v1 }
 0x3c8   :  { %301 = vperm.xlu1 %415, %v295_v13  }
 0x3cc   :  { %304 = vperm.xlu1 %415, %v297_v16  }
 0x443   :  { %v302_v18 = vpop.permute.xlu1 %301 }
 0x444   :  { %v319_v19 = vmul.f32 %v302_v18, %v30_v17  ;;  %v309_v22 = vrot.slane %v302_v18, %v232_v50 }
 0x446   :  { %v321_v14 = vsel %vm48_vm0, %v319_v19, 0.0 }
 0x447   :  { %v322_v20 = vrot.slane %v321_v14, 4  ;;  %v305_v21 = vpop.permute.xlu1 %304 }
 0x448   :  { %v313_v23 = vrot.slane %v305_v21, %v232_v50  ;;  %v320_v24 = vmul.f32 %v305_v21, %v31_v12 }
 0x449   :  { %v323_v25 = vadd.f32 %v322_v20, %v321_v14 }
 0x44a   :  { %v328_v26 = vsel %vm48_vm0, %v320_v24, 0.0  ;;  %v314_v27 = vsel %vm238_vm2, %v313_v23, %v309_v22 }
 0x44b   :  { %v324_v28 = vrot.slane %v323_v25, 2  ;;  %v329_v29 = vrot.slane %v328_v26, 4  ;;  %316 = vst.msk [vmem:[#allocation4] sm:$0x3] %vm241_vm3, %v314_v27 }
 0x44c   :  { %439 = shalt.err (!%p436_p4)
}
 0x44d   :  { %360 = dma.vmem_to_hbm [thread:$0]  %s358_s10, 32, %s617_s8, [#allocation5]   ;;  %v325_v30 = vadd.f32 %v324_v28, %v323_v25  ;;  %v330_v31 = vadd.f32 %v329_v29, %v328_v26  ;;  %vm339_vm4 = vcmask 517120  }
 0x44e   :  { %s477_s13 = smov [#allocation2]  }
 0x44f   :  { %v331_v32 = vrot.slane %v330_v31, 2  ;;  %v326_v34 = vrot.slane %v325_v30, 1  ;;  %s347_s14 = sshll.u32 %s477_s13, 4  ;;  %s348_s14 = int_to_ptr.vmem [resolvable:$true] %s347_s14 }
 0x450   :  { %s448_s15 = scalar_lea.vmem %s348_s14, 32  ;;  %p453_p6 = scmp.lt.s32.totalorder %s348_s14, %s348_s14 }
 0x451   :  { %v332_v33 = vadd.f32 %v331_v32, %v330_v31  ;;  %v327_v36 = vadd.f32 %v326_v34, %v325_v30  ;;  %p449_p5 = scmp.ne.s32.totalorder %s348_s14, %s448_s15  ;;  %p454_p7 = scmp.lt.s32.totalorder %s448_s15, %s448_s15 }
 0x453   :  { %v333_v35 = vrot.slane %v332_v33, 1  ;;  %p455_p8 = por %p454_p7, %p453_p6 }
 0x455   :  { %v334_v37 = vadd.f32 %v333_v35, %v332_v33  ;;  %p456_p9 = pnand %p455_p8, %p449_p5 }
 0x457   :  { %v337_v38 = vsel %vm238_vm2, %v334_v37, %v327_v36 }
 0x458   :  { %340 = vst.msk [vmem:[#allocation2] sm:$0x3] %vm339_vm4, %v337_v38 }
 0x459   :  { %459 = shalt.err (!%p456_p9)
}
 0x45a   :  { %350 = dma.vmem_to_hbm [thread:$0]  %s348_s14, 32, %s616_s7, [#allocation3]  }
 0x45b   :  { %468 = dma.done.wait [#allocation3], 32  }
 0x45c   :  { %469 = vsyncadd [#allocation3], 4294967264 }
 0x45d   :  { %470 = dma.done.wait [#allocation5], 32  }
 0x45e   :  { %471 = vsyncadd [#allocation5], 4294967264 }
 0x45f   :  { %367 = vsyncpa [#allocation3], 1 }
 0x460   :  { %368 = vsyncpa [#allocation5], 1 }

</bundles_post_ra>
